<compile_context>
chip_gen: v5e
topology: v5e:2x2
jax: 0.10.0
libtpu: 0.0.40
codegen_flags: <defaults>
</compile_context>

<pallas_src>
import functools
import math

import jax
import jax.numpy as jnp
from jax.experimental import pallas as pl
from jax.experimental.pallas import tpu as pltpu


NUM_INPUT_DIM = 16  # adapter metadata; the forward never uses it

_MIN_BYTES_FOR_SPLIT = 1 << 20   # don't bother splitting copies below 1 MiB
_MAX_OUTSTANDING_DMAS = 4        # a few in-flight descriptors saturate HBM


def input_adapter_forward(x: jax.Array) -> jax.Array:
    """InputAdapter.forward — the identity. No kernel, no HBM round-trip."""
    return x


def _chunk_plan(dim0: int, nchunks: int):
    """Static, roughly-equal split of the leading axis into (start, size)."""
    base, rem = divmod(dim0, nchunks)
    plan, off = [], 0
    for c in range(nchunks):
        size = base + (1 if c < rem else 0)
        plan.append((off, size))
        off += size
    return tuple(plan)


@functools.lru_cache(maxsize=None)
def _build_copy(shape: tuple, dtype_name: str):
    """Build + jit one HBM->HBM DMA copy kernel per (shape, dtype)."""
    dtype = jnp.dtype(dtype_name)
    n = math.prod(shape) if shape else 1
    nbytes = n * dtype.itemsize

    if len(shape) >= 1 and shape[0] >= 2 and nbytes >= _MIN_BYTES_FOR_SPLIT:
        nchunks = min(_MAX_OUTSTANDING_DMAS, shape[0])
    else:
        nchunks = 1
    chunks = _chunk_plan(shape[0], nchunks) if nchunks > 1 else None

    def copy_kernel(x_hbm, o_hbm, sems):
        # Direct HBM->HBM DMA copy of the unmodified buffer. Identical
        # src/dst shapes and layouts, so no relayout and no VMEM staging.
        if chunks is None:
            cp = pltpu.make_async_copy(x_hbm, o_hbm, sems.at[0])
            cp.start()
            cp.wait()
        else:
            # Issue all chunk DMAs first (overlapped), then wait on each.
            for c, (start, size) in enumerate(chunks):
                pltpu.make_async_copy(
                    x_hbm.at[pl.ds(start, size)],
                    o_hbm.at[pl.ds(start, size)],
                    sems.at[c],
                ).start()
            for c, (start, size) in enumerate(chunks):
                pltpu.make_async_copy(
                    x_hbm.at[pl.ds(start, size)],
                    o_hbm.at[pl.ds(start, size)],
                    sems.at[c],
                ).wait()

    copy_fn = pl.pallas_call(
        copy_kernel,
        out_shape=jax.ShapeDtypeStruct(shape, dtype),
        in_specs=[pl.BlockSpec(memory_space=pl.ANY)],
        out_specs=pl.BlockSpec(memory_space=pl.ANY),
        scratch_shapes=[pltpu.SemaphoreType.DMA((nchunks,))],
        cost_estimate=pl.CostEstimate(
            flops=0, transcendentals=0, bytes_accessed=2 * nbytes),
    )
    return jax.jit(copy_fn)


def input_adapter_forward_pallas(x: jax.Array) -> jax.Array:
    """Identity materialized into a fresh HBM buffer via a Pallas DMA copy.

    Only needed when a framework requires a distinct output buffer; otherwise
    prefer `input_adapter_forward`, which returns x directly.
    """
    if x.size == 0:
        return x  # nothing to copy
    copy_fn = _build_copy(tuple(x.shape), jnp.dtype(x.dtype).name)
    return copy_fn(x)


if __name__ == "__main__":
    key = jax.random.PRNGKey(0)
    k1, k2 = jax.random.split(key)

    # Small NCHW f32 input.
    x_f32 = jax.random.normal(k1, (2, 4, 16, 16), dtype=jnp.float32)
    # Odd-sized bf16 input (no padding / reshape is needed on this path).
    x_bf16 = jax.random.normal(k2, (2, 3, 17, 16), dtype=jnp.bfloat16)

    # Fast path: true identity, no kernel.
    y_fast = input_adapter_forward(x_f32)
    assert y_fast.shape == x_f32.shape and y_fast.dtype == x_f32.dtype
    assert bool(jnp.all(y_fast == x_f32))

    # Pallas HBM->HBM DMA copy path.
    y_f32 = jax.block_until_ready(input_adapter_forward_pallas(x_f32))
    assert y_f32.shape == x_f32.shape and y_f32.dtype == x_f32.dtype
    assert bool(jnp.all(y_f32 == x_f32))

    y_bf16 = jax.block_until_ready(input_adapter_forward_pallas(x_bf16))
    assert y_bf16.shape == x_bf16.shape and y_bf16.dtype == x_bf16.dtype
    assert bool(jnp.all(y_bf16 == x_bf16))

    print("KERNEL_OK")
</pallas_src>

<mosaic_0001>
module attributes {stable_mosaic.version = 11 : i64} {
  func.func @copy_kernel(%arg0: memref<2x4x16x16xf32, #tpu.memory_space<any>>, %arg1: memref<2x4x16x16xf32, #tpu.memory_space<any>>, %arg2: memref<1x!tpu.dma_semaphore, #tpu.memory_space<semaphore_mem>>) attributes {dimension_semantics = [], scalar_prefetch = 0 : i64, scratch_operands = 1 : i64, tpu.core_type = #tpu.core_type<tc>} {
    %c0_i32 = arith.constant 0 : i32
    %0 = tpu.memref_slice %arg2[%c0_i32] : memref<1x!tpu.dma_semaphore, #tpu.memory_space<semaphore_mem>> -> memref<1x!tpu.dma_semaphore, #tpu.memory_space<semaphore_mem>>
    %1 = tpu.memref_squeeze %0 : memref<1x!tpu.dma_semaphore, #tpu.memory_space<semaphore_mem>> -> memref<!tpu.dma_semaphore, #tpu.memory_space<semaphore_mem>>
    tpu.enqueue_dma source(%arg0 : memref<2x4x16x16xf32, #tpu.memory_space<any>>) target(%arg1 : memref<2x4x16x16xf32, #tpu.memory_space<any>>) target_semaphore(%1 : memref<!tpu.dma_semaphore, #tpu.memory_space<semaphore_mem>>)
    %c0_i32_0 = arith.constant 0 : i32
    %2 = tpu.memref_slice %arg2[%c0_i32_0] : memref<1x!tpu.dma_semaphore, #tpu.memory_space<semaphore_mem>> -> memref<1x!tpu.dma_semaphore, #tpu.memory_space<semaphore_mem>>
    %3 = tpu.memref_squeeze %2 : memref<1x!tpu.dma_semaphore, #tpu.memory_space<semaphore_mem>> -> memref<!tpu.dma_semaphore, #tpu.memory_space<semaphore_mem>>
    tpu.wait_dma2 semaphore(%3 : memref<!tpu.dma_semaphore, #tpu.memory_space<semaphore_mem>>) src(%arg0 : memref<2x4x16x16xf32, #tpu.memory_space<any>>) dst(%arg1 : memref<2x4x16x16xf32, #tpu.memory_space<any>>)
    return
  }
}

</mosaic_0001>

<bundles_post_ra>
// kernel: tpu_custom_call.1
= control target key start
LH: loop header
LB: loop body
LE: loop exit
PB: predicated region body
PF: predicated region fallthrough
CT: control target
= control target key end

     0   :  { %s34_s12 = smov [#allocation2]   ;;  %s35_s13 = smov [#allocation3]   ;;  %s53_s0 = inlined_call_operand.hbm [shape: f32[2,4,16,16], index: 0, kind: input, shape index: {}]   ;;  %s54_s1 = inlined_call_operand.hbm [shape: f32[2,4,16,16], index: 1, kind: output, shape index: {}]  }
   0x1   :  { %s10_s8 = sshll.u32 %s53_s0, 4  ;;  %s12_s11 = sshll.u32 %s54_s1, 4  ;;  %s11_s8 = int_to_ptr.hbm [resolvable:$true] %s10_s8  ;;  %s13_s11 = int_to_ptr.hbm [resolvable:$true] %s12_s11 }
   0x2   :  { %s36_s14 = smov 0  }
   0x3   :  { %16 = dma.general %s11_s8, 2048, %s13_s11, %s34_s12, %s35_s13, [#allocation4], %s36_s14, 0  }
   0x4   :  { %32 = dma.done.wait [#allocation2], 2048 }
   0x5   :  { %33 = vsyncadd [#allocation2], 4294965248 }
   0x6   :  { %22 = vsyncmov [#allocation2] }
   0x9   :  { %s23_s15 = vpop.sfrf %22 }
   0xa   :  { %p28_p0 = scmp.ne.s32.totalorder %s23_s15, 0 }
   0xc   :  { %27 = shalt.err (%p28_p0)  }

</bundles_post_ra>
